<compile_context>
chip_gen: v6e
topology: v6e:2x2x1
jax: 0.10.0
libtpu: 0.0.40
codegen_flags: <defaults>
</compile_context>

<pallas_src>
import jax
import jax.numpy as jnp
from jax import lax
from jax.experimental import pallas as pl
from jax.experimental.pallas import tpu as pltpu


def _round_up(x, m):
    return ((x + m - 1) // m) * m


def _fit_tile_m(tile_m, c_pad, n_pad, budget_bytes=14 * 1024 * 1024):
    """Shrink tile_m (keeping a multiple of 8 / power-of-two steps) so the
    double-buffered x/out blocks plus the resident bf16 weight fit comfortably
    under v5e's 16 MiB default scoped-VMEM limit (safe on every generation)."""
    while tile_m > 128:
        need = (2 * tile_m * c_pad * 2      # x blocks  (bf16, double-buffered)
                + 2 * tile_m * n_pad * 4    # out blocks (f32, double-buffered)
                + 2 * c_pad * n_pad * 2     # weight    (bf16, 2 bufs allocated)
                + 2 * n_pad * 4)            # bias
        if need <= budget_bytes:
            break
        tile_m //= 2
    return tile_m


# ----------------------------------------------------------------------------
# Pallas kernel: one (TILE_M, C_pad) x (C_pad, N_pad) MXU tile of y = x @ W^T + b.
#   x_ref : (TILE_M, C_pad)   bf16  rows of the flattened NHWC feature map
#   w_ref : (C_pad, N_pad)    bf16  full projection weight (VMEM-resident)
#   b_ref : (1, N_pad)        f32   full projection bias   (VMEM-resident)
#   o_ref : (TILE_M, N_pad)   f32   output tile (lane-dense, 128-aligned)
# ----------------------------------------------------------------------------
def _proj_kernel(x_ref, w_ref, b_ref, o_ref):
    acc = jnp.dot(x_ref[...], w_ref[...], preferred_element_type=jnp.float32)
    o_ref[...] = (acc + b_ref[...]).astype(o_ref.dtype)


def hybrid_embed_proj(feat_nhwc, w_proj, b_proj, *, tile_m=512):
    """proj(feat).flatten(2).transpose(1,2) as a single weight-resident Pallas GEMM.

    feat_nhwc: (B, Hf, Wf, C) backbone features, channels-last, ideally bf16.
    w_proj   : (E, C)  Conv2d 1x1 weight squeezed.
    b_proj   : (E,)    Conv2d bias.
    returns  : (B, Hf*Wf, E) float32.
    """
    B, Hf, Wf, C = feat_nhwc.shape
    E = b_proj.shape[0]
    P = Hf * Wf
    M = B * P

    c_pad = _round_up(C, 128)   # keep the MXU contraction dim lane-dense
    n_pad = _round_up(E, 128)   # lane-dense (unmasked) output stores

    # NHWC -> (M, C) is a pure reshape (no transpose, no extra HBM pass: the
    # bf16 cast already happened in the backbone epilogue).
    x = feat_nhwc.reshape(M, C)
    if x.dtype != jnp.bfloat16:
        x = x.astype(jnp.bfloat16)          # only hit for non-bf16 callers
    if c_pad != C:
        # Tiny/toy feature dims only; real backbones (C >= 1024) skip this.
        x = jnp.pad(x, ((0, 0), (0, c_pad - C)))

    # Weight (E, C) -> (C_pad, N_pad) bf16 and bias (1, N_pad) f32, prepared
    # once; constant block index keeps them VMEM-resident across the grid.
    w = jnp.transpose(w_proj).astype(jnp.bfloat16)
    w = jnp.pad(w, ((0, c_pad - C), (0, n_pad - E)))
    b = jnp.pad(b_proj.astype(jnp.float32).reshape(1, E), ((0, 0), (0, n_pad - E)))

    # Tile selection: clamp for tiny M, then shrink to fit the VMEM budget.
    tile_m = min(tile_m, _round_up(M, 8))
    tile_m = _fit_tile_m(tile_m, c_pad, n_pad)

    grid = (pl.cdiv(M, tile_m),)            # ragged last tile handled by masking

    cost = pl.CostEstimate(
        flops=int(2 * M * c_pad * n_pad),
        transcendentals=0,
        bytes_accessed=int(M * c_pad * 2 + c_pad * n_pad * 2 + n_pad * 4
                           + M * n_pad * 4),
    )

    out = pl.pallas_call(
        _proj_kernel,
        out_shape=jax.ShapeDtypeStruct((M, n_pad), jnp.float32),
        grid_spec=pltpu.PrefetchScalarGridSpec(
            num_scalar_prefetch=0,
            grid=grid,
            in_specs=[
                pl.BlockSpec((tile_m, c_pad), lambda i: (i, 0)),   # activation rows
                pl.BlockSpec((c_pad, n_pad), lambda i: (0, 0)),    # resident weight
                pl.BlockSpec((1, n_pad), lambda i: (0, 0)),        # resident bias
            ],
            out_specs=pl.BlockSpec((tile_m, n_pad), lambda i: (i, 0)),
        ),
        compiler_params=pltpu.CompilerParams(
            # Single independent M axis -> shards across TensorCores (v7x) even
            # for B == 1, since M = B*P.  No vmem_limit override needed at
            # these block sizes on any generation.
            dimension_semantics=("parallel",),
        ),
        cost_estimate=cost,
    )(x, w, b)

    if n_pad != E:
        out = out[:, :E]
    return out.reshape(B, P, E)


# ----------------------------------------------------------------------------
# Synthetic backbone (glue, plain JAX).  HybridEmbed accepts an arbitrary
# nn.Module backbone; here a deterministic single strided conv + ReLU is used,
# emitting bf16 NHWC features so the projection needs no activation transpose
# and no separate cast pass.
# TODO(synk): arbitrary user backbones are not translatable generically;
#             a fixed synthetic conv backbone is used instead.
# ----------------------------------------------------------------------------
def backbone_forward(x_nchw, w_bb, b_bb, stride=4):
    y = lax.conv_general_dilated(
        x_nchw, w_bb,
        window_strides=(stride, stride),
        padding=((1, 1), (1, 1)),
        dimension_numbers=("NCHW", "OIHW", "NHWC"),   # NHWC output: free reshape later
    )
    y = y + b_bb.reshape(1, 1, 1, -1)
    y = jnp.maximum(y, 0.0)
    return y.astype(jnp.bfloat16)                     # cast fuses into the conv epilogue


def hybrid_embed_forward(x_nchw, params):
    feat = backbone_forward(x_nchw, params["w_bb"], params["b_bb"])
    return hybrid_embed_proj(feat, params["w_proj"], params["b_proj"])


if __name__ == "__main__":
    # Small shapes: batch=2, in_chans=3, img=16x16; backbone stride 4 ->
    # 4x4 feature map with feature_dim=8; embed_dim=32; num_patches=16.
    B, in_chans, img = 2, 3, 16
    feature_dim, embed_dim = 8, 32
    stride = 4

    key = jax.random.PRNGKey(0)
    k1, k2, k3, k4, k5 = jax.random.split(key, 5)

    x = jax.random.normal(k1, (B, in_chans, img, img), dtype=jnp.float32)
    params = {
        "w_bb":   0.1 * jax.random.normal(k2, (feature_dim, in_chans, 3, 3), jnp.float32),
        "b_bb":   0.1 * jax.random.normal(k3, (feature_dim,), jnp.float32),
        "w_proj": 0.1 * jax.random.normal(k4, (embed_dim, feature_dim), jnp.float32),
        "b_proj": 0.1 * jax.random.normal(k5, (embed_dim,), jnp.float32),
    }

    fwd = jax.jit(hybrid_embed_forward)
    out = jax.block_until_ready(fwd(x, params))

    # Reference (pure JAX) with the same bf16 operand rounding as the kernel.
    feat = backbone_forward(x, params["w_bb"], params["b_bb"], stride=stride)  # bf16 NHWC
    ref = jnp.einsum(
        "bhwc,ec->bhwe",
        feat.astype(jnp.float32),
        params["w_proj"].astype(jnp.bfloat16).astype(jnp.float32),
    ) + params["b_proj"]
    ref = ref.reshape(B, -1, embed_dim)

    num_patches = (img // stride) * (img // stride)
    assert out.shape == (B, num_patches, embed_dim), out.shape
    assert jnp.allclose(out, ref, atol=1e-4, rtol=1e-4), float(jnp.max(jnp.abs(out - ref)))

    print("KERNEL_OK")
</pallas_src>

<mosaic_0001>
module attributes {stable_mosaic.version = 11 : i64} {
  func.func @_proj_kernel(%arg0: i32, %arg1: memref<32x128xbf16, #tpu.memory_space<vmem>>, %arg2: memref<128x128xbf16, #tpu.memory_space<vmem>>, %arg3: memref<1x128xf32, #tpu.memory_space<vmem>>, %arg4: memref<32x128xf32, #tpu.memory_space<vmem>>) attributes {dimension_semantics = [#tpu.dimension_semantics<parallel>], iteration_bounds = array<i64: 1>, scalar_prefetch = 0 : i64, scratch_operands = 0 : i64, tpu.core_type = #tpu.core_type<tc>, window_params = [{transform_indices = @transform_0, window_bounds = array<i64: 32, 128>}, {pipeline_mode = #tpu.pipeline_mode<synchronous>, transform_indices = @transform_1, window_bounds = array<i64: 128, 128>}, {pipeline_mode = #tpu.pipeline_mode<synchronous>, transform_indices = @transform_2, window_bounds = array<i64: 1, 128>}, {transform_indices = @transform_3, window_bounds = array<i64: 32, 128>}]} {
    %c0 = arith.constant 0 : index
    %c0_0 = arith.constant 0 : index
    %0 = vector.load %arg1[%c0, %c0_0] : memref<32x128xbf16, #tpu.memory_space<vmem>>, vector<32x128xbf16>
    %c0_1 = arith.constant 0 : index
    %c0_2 = arith.constant 0 : index
    %1 = vector.load %arg2[%c0_1, %c0_2] : memref<128x128xbf16, #tpu.memory_space<vmem>>, vector<128x128xbf16>
    %cst = arith.constant dense<0.000000e+00> : vector<32x128xf32>
    %2 = tpu.matmul %0, %1, %cst {dimension_numbers = #tpu.dot_dimension_numbers<[1], [0], [0], [1], [0, 0, 1, 1], [], []>} : vector<32x128xbf16>, vector<128x128xbf16>, vector<32x128xf32> -> vector<32x128xf32>
    %c0_3 = arith.constant 0 : index
    %c0_4 = arith.constant 0 : index
    %3 = vector.load %arg3[%c0_3, %c0_4] : memref<1x128xf32, #tpu.memory_space<vmem>>, vector<1x128xf32>
    %4 = vector.broadcast %3 : vector<1x128xf32> to vector<32x128xf32>
    %5 = arith.addf %2, %4 : vector<32x128xf32>
    %c0_5 = arith.constant 0 : index
    %c0_6 = arith.constant 0 : index
    %6 = vector.load %arg4[%c0_5, %c0_6] : memref<32x128xf32, #tpu.memory_space<vmem>>, vector<32x128xf32>
    tpu.vector_store %arg4[%c0_5, %c0_6], %5 {strides = array<i32>} : memref<32x128xf32, #tpu.memory_space<vmem>>, vector<32x128xf32>,
    return
  }
  func.func @transform_0(%arg0: i32) -> (i32, i32) {
    %c0_i32 = arith.constant 0 : i32
    %c0_i32_0 = arith.constant 0 : i32
    return %arg0, %c0_i32 : i32, i32
  }
  func.func @transform_1(%arg0: i32) -> (i32, i32) {
    %c0_i32 = arith.constant 0 : i32
    %c0_i32_0 = arith.constant 0 : i32
    %c0_i32_1 = arith.constant 0 : i32
    return %c0_i32, %c0_i32_0 : i32, i32
  }
  func.func @transform_2(%arg0: i32) -> (i32, i32) {
    %c0_i32 = arith.constant 0 : i32
    %c0_i32_0 = arith.constant 0 : i32
    %c0_i32_1 = arith.constant 0 : i32
    return %c0_i32, %c0_i32_0 : i32, i32
  }
  func.func @transform_3(%arg0: i32) -> (i32, i32) {
    %c0_i32 = arith.constant 0 : i32
    %c0_i32_0 = arith.constant 0 : i32
    return %arg0, %c0_i32 : i32, i32
  }
}

</mosaic_0001>

<bundles_post_ra>
// kernel: hybrid_embed_forward.1
= control target key start
LH: loop header
LB: loop body
LE: loop exit
PB: predicated region body
PF: predicated region fallthrough
CT: control target
= control target key end

     0   :  { %s307_s0 = inlined_call_operand.vmem [shape: bf16[32,128], index: 0, kind: input, shape index: {}]   ;;  %s308_s1 = inlined_call_operand.vmem [shape: bf16[128,128], index: 1, kind: input, shape index: {}]   ;;  %s309_s2 = inlined_call_operand.vmem [shape: f32[1,128], index: 2, kind: input, shape index: {}]   ;;  %s310_s3 = inlined_call_operand.hbm [shape: f32[32,128], index: 3, kind: output, shape index: {}]  }
   0x1   :  { %v216_v0 = vld [vmem:[%s308_s1 + $0x38] sm:$0xff]   ;;  %v217_v1 = vld [vmem:[%s308_s1 + $0x30] sm:$0xff]   ;;  %v218_v2 = vld [vmem:[%s308_s1 + $0x28] sm:$0xff]  }
   0x2   :  { %193 = vmatprep.subr.bf16.mxu0 %v216_v0  ;;  %v219_v3 = vld [vmem:[%s308_s1 + $0x20] sm:$0xff]  }
   0x3   :  { %194 = vmatpush3.bf16.msra.mxu0 %v216_v0  ;;  %v224_v4 = vld [vmem:[%s307_s0] sm:$0xff]  }
   0x4   :  { %195 = vmatprep.subr.bf16.mxu0 %v217_v1  ;;  %209 = vmatprep.mubr.bf16.mxu0 %v224_v4 }
   0x7   :  { %196 = vmatpush3.bf16.msra.mxu0 %v217_v1 }
   0x8   :  { %197 = vmatprep.subr.bf16.mxu0 %v218_v2 }
   0x9   :  { %8 = vsyncpa [#allocation3], 0  ;;  %v220_v5 = vld [vmem:[%s308_s1 + $0x18] sm:$0xff]   ;;  %v221_v6 = vld [vmem:[%s308_s1 + $0x10] sm:$0xff]   ;;  %s248_s7 = smov [#allocation2]  }
   0xa   :  { %v222_v7 = vld [vmem:[%s308_s1 + $0x8] sm:$0xff]   ;;  %v223_v8 = vld [vmem:[%s308_s1] sm:$0xff]   ;;  %s161_s8 = sshll.u32 %s248_s7, 4  ;;  %s162_s8 = int_to_ptr.vmem [resolvable:$true] %s161_s8 }
   0xb   :  { %198 = vmatpush3.bf16.msra.mxu0 %v218_v2  ;;  %v225_v9 = vld [vmem:[%s307_s0 + $0x8] sm:$0xff]   ;;  %v172_v10 = vld [vmem:[%s309_s2] ss:$0 sm:$0xff]  ;;  %s226_s0 = scalar_lea.vmem %s162_s8, 512  ;;  %p231_p1 = scmp.lt.s32.totalorder %s162_s8, %s162_s8 }
   0xc   :  { %199 = vmatprep.subr.bf16.mxu0 %v219_v3  ;;  %p227_p0 = scmp.ne.s32.totalorder %s162_s8, %s226_s0  ;;  %p232_p2 = scmp.lt.s32.totalorder %s226_s0, %s226_s0 }
   0xe   :  { %p233_p3 = por %p232_p2, %p231_p1 }
   0xf   :  { %200 = vmatpush3.bf16.msra.mxu0 %v219_v3 }
  0x10   :  { %201 = vmatprep.subr.bf16.mxu0 %v220_v5  ;;  %p234_p4 = pnand %p233_p3, %p227_p0 }
  0x13   :  { %202 = vmatpush3.bf16.msra.mxu0 %v220_v5 }
  0x14   :  { %203 = vmatprep.subr.bf16.mxu0 %v221_v6 }
  0x17   :  { %204 = vmatpush3.bf16.msra.mxu0 %v221_v6 }
  0x18   :  { %205 = vmatprep.subr.bf16.mxu0 %v222_v7 }
  0x1b   :  { %206 = vmatpush3.bf16.msra.mxu0 %v222_v7 }
  0x1c   :  { %207 = vmatprep.subr.bf16.mxu0 %v223_v8 }
  0x1f   :  { %208 = vmatpush3.bf16.msra.mxu0 %v223_v8 }
  0x22   :  { %210 = vmatmul.mubr.bf16.vlgmr.msra.gmra.mxu0 %v225_v9 }
  0xe2   :  { %v211_v11 = vpop.f32.mrf.mxu0 }
  0xe3   :  { %v146_v12 = vadd.f32 %v211_v11, %v172_v10 }
  0xe4   :  { %v137_v13 = vpop.f32.mrf.mxu0 }
  0xe5   :  { %154 = vst [vmem:[#allocation2 + $0x10] sm:$0xff] %v146_v12  ;;  %v138_v14 = vadd.f32 %v172_v10, %v137_v13 }
  0xe6   :  { %v212_v15 = vpop.f32.mrf.mxu0 }
  0xe7   :  { %152 = vst [vmem:[#allocation2] sm:$0xff] %v138_v14  ;;  %v149_v16 = vadd.f32 %v212_v15, %v172_v10 }
  0xe8   :  { %v140_v17 = vpop.f32.mrf.mxu0 }
  0xe9   :  { %155 = vst [vmem:[#allocation2 + $0x18] sm:$0xff] %v149_v16  ;;  %v141_v18 = vadd.f32 %v172_v10, %v140_v17 }
  0xeb   :  { %153 = vst [vmem:[#allocation2 + $0x8] sm:$0xff] %v141_v18 }
  0xec   :  { %237 = shalt.err (!%p234_p4)
}
  0xed   :  { %s249_s1 = smov 128   ;;  %s250_s2 = smov 8  }
  0xee   :  { %167 = dma.vmem_to_hbm [thread:$0]  %s162_s8, 512, %s310_s3, [#allocation3], %s249_s1, %s249_s1, %s250_s2  }
  0xef   :  { %246 = dma.done.wait [#allocation3], 512  }
  0xf0   :  { %247 = vsyncadd [#allocation3], 4294966784 }
  0xf1   :  { %171 = vsyncpa [#allocation3], 1 }

</bundles_post_ra>
